<compile_context>
chip_gen: v5e
topology: v5e:2x2
jax: 0.10.0
libtpu: 0.0.40
codegen_flags: <defaults>
</compile_context>

<pallas_src>
import jax
import jax.numpy as jnp
from jax.experimental import pallas as pl
from jax.experimental.pallas import tpu as pltpu

EPS = 1e-5          # nn.BatchNorm2d default
NEG_SLOPE = 0.01    # nn.LeakyReLU default


def _double_conv_kernel(x_ref, t1_ref, t2_ref, g1_ref, b1_ref, g2_ref, b2_ref,
                        sel_ref, selt_ref, o_ref, xp1_ref, xp2_ref):
    """Fused (Conv3x3 -> BN(batch stats) -> LeakyReLU) x 2, fully in VMEM.

    x_ref    : (N, H, W*Cin)        bf16  input rows, channel-minor on lanes
    t1_ref   : (3, W*Cin,  W*Cout)  bf16  banded conv-1 weight, one per ky
    t2_ref   : (3, W*Cout, W*Cout)  bf16  banded conv-2 weight, one per ky
    g*/b*    : (1, Cout)            f32   BN gamma / beta
    sel_ref  : (W*Cout, Cout)       f32   0/1 channel selector (fold W on lanes)
    selt_ref : (Cout, W*Cout)       f32   its transpose (per-channel broadcast)
    o_ref    : (N*H, W*Cout)        f32   lane-dense output
    xp1/xp2  : (N, H+2, W*C)        f32   H-zero-padded row slabs (VMEM scratch)
    """
    N, H, _ = x_ref.shape
    WCout, Cout = sel_ref.shape
    W = WCout // Cout
    inv_cnt = 1.0 / (N * H * W)

    def conv3x3(xp_ref, t_ref):
        # 3 banded MXU matmuls (one per ky). K folds kx, W and the channel
        # contraction; W zero-padding is baked into the zero bands of t_ref.
        k = t_ref.shape[1]
        acc = jnp.zeros((N * H, WCout), jnp.float32)
        for ky in range(3):  # unrolled: 3 MXU pushes per conv
            lhs = xp_ref[:, ky:ky + H, :].reshape(N * H, k).astype(jnp.bfloat16)
            acc += jnp.dot(lhs, t_ref[ky], preferred_element_type=jnp.float32)
        return acc

    def bn_lrelu(acc, gamma, beta):
        # BatchNorm2d training forward (biased batch variance), folded to one
        # per-channel scale/shift. Channels are strided along the lane axis,
        # so the per-channel reduce / broadcast go through tiny 0/1 selector
        # matmuls instead of minor-dim reshapes.
        row_sum = jnp.sum(acc, axis=0, keepdims=True)                      # (1, W*Cout)
        mean = jnp.dot(row_sum, sel_ref[...],
                       preferred_element_type=jnp.float32) * inv_cnt       # (1, Cout)
        centered = acc - jnp.dot(mean, selt_ref[...],
                                 preferred_element_type=jnp.float32)
        sq_sum = jnp.sum(centered * centered, axis=0, keepdims=True)
        var = jnp.dot(sq_sum, sel_ref[...],
                      preferred_element_type=jnp.float32) * inv_cnt        # (1, Cout)
        scale = gamma * jax.lax.rsqrt(var + EPS)                           # EUP rsqrt
        scale_row = jnp.dot(scale, selt_ref[...],
                            preferred_element_type=jnp.float32)            # (1, W*Cout)
        shift_row = jnp.dot(beta, selt_ref[...],
                            preferred_element_type=jnp.float32)
        y = centered * scale_row + shift_row                               # one FMA pass
        return jnp.where(y >= 0, y, NEG_SLOPE * y)                         # LeakyReLU(0.01)

    # ---- block 1: pad(H) -> conv -> BN -> LeakyReLU (all in VMEM) ----
    xp1_ref[...] = jnp.zeros(xp1_ref.shape, xp1_ref.dtype)
    xp1_ref[:, 1:H + 1, :] = x_ref[...].astype(xp1_ref.dtype)
    y1 = bn_lrelu(conv3x3(xp1_ref, t1_ref), g1_ref[...], b1_ref[...])

    # ---- block 2: the intermediate activation never leaves VMEM ----
    xp2_ref[...] = jnp.zeros(xp2_ref.shape, xp2_ref.dtype)
    xp2_ref[:, 1:H + 1, :] = y1.reshape(N, H, WCout)
    y2 = bn_lrelu(conv3x3(xp2_ref, t2_ref), g2_ref[...], b2_ref[...])

    o_ref[...] = y2.astype(o_ref.dtype)


def _banded_weight(w_hwio, W):
    """(3, 3, Ci, Co) HWIO -> (3, W*Ci, W*Co) banded/Toeplitz matrices.

    T[ky][x*Ci + ci, w*Co + co] = w[ky, x - w + 1, ci, co] if 0 <= x-w+1 <= 2
    else 0.  One MXU contraction then folds kx, the channels and the W axis,
    with the W zero-padding handled implicitly by the zero bands.
    """
    _, _, Ci, Co = w_hwio.shape
    kx = jnp.arange(W)[:, None] - jnp.arange(W)[None, :] + 1        # (W, W)
    valid = (kx >= 0) & (kx <= 2)
    kx_c = jnp.clip(kx, 0, 2)

    def one(ky):
        t = w_hwio[ky][kx_c]                                        # (W, W, Ci, Co)
        t = jnp.where(valid[:, :, None, None], t, 0.0)
        return jnp.transpose(t, (0, 2, 1, 3)).reshape(W * Ci, W * Co)

    return jnp.stack([one(ky) for ky in range(3)], axis=0)


@jax.jit
def double_conv(x_nchw, params):
    """DoubleConv forward. NCHW in / NCHW out to match the PyTorch module."""
    N, Cin, H, W = x_nchw.shape
    Cout = params["w1"].shape[-1]

    # NCHW -> (N, H, W*Cin) rows, channel-minor on the lane axis.
    # (An NHWC-native pipeline would drop this transpose entirely.)
    x_rows = jnp.transpose(x_nchw, (0, 2, 3, 1)).reshape(N, H, W * Cin)
    x_rows = x_rows.astype(jnp.bfloat16)                 # bf16 HBM read / MXU lhs

    t1 = _banded_weight(params["w1"], W).astype(jnp.bfloat16)   # (3, W*Cin,  W*Cout)
    t2 = _banded_weight(params["w2"], W).astype(jnp.bfloat16)   # (3, W*Cout, W*Cout)

    sel = jnp.tile(jnp.eye(Cout, dtype=jnp.float32), (W, 1))    # (W*Cout, Cout)
    selt = sel.T                                                # (Cout, W*Cout)

    g1 = params["gamma1"].reshape(1, Cout).astype(jnp.float32)
    b1 = params["beta1"].reshape(1, Cout).astype(jnp.float32)
    g2 = params["gamma2"].reshape(1, Cout).astype(jnp.float32)
    b2 = params["beta2"].reshape(1, Cout).astype(jnp.float32)

    flops = 2 * N * H * W * 9 * (Cin * Cout + Cout * Cout)
    bytes_accessed = (x_rows.size * 2 + t1.size * 2 + t2.size * 2
                      + (sel.size + selt.size + 4 * Cout) * 4
                      + N * H * W * Cout * 4)

    out2d = pl.pallas_call(
        _double_conv_kernel,
        out_shape=jax.ShapeDtypeStruct((N * H, W * Cout), jnp.float32),
        in_specs=[pl.BlockSpec(memory_space=pltpu.MemorySpace.VMEM)] * 9,
        out_specs=pl.BlockSpec(memory_space=pltpu.MemorySpace.VMEM),
        scratch_shapes=[
            pltpu.VMEM((N, H + 2, W * Cin), jnp.float32),   # padded input rows
            pltpu.VMEM((N, H + 2, W * Cout), jnp.float32),  # padded block-1 activation
        ],
        compiler_params=pltpu.CompilerParams(vmem_limit_bytes=32 * 1024 * 1024),
        cost_estimate=pl.CostEstimate(flops=flops, transcendentals=2 * Cout,
                                      bytes_accessed=bytes_accessed),
    )(x_rows, t1, t2, g1, b1, g2, b2, sel, selt)

    # (N*H, W*Cout) -> NCHW: the reshape is free; the small transpose is kept
    # only because the public interface is PyTorch NCHW.
    return out2d.reshape(N, H, W, Cout).transpose(0, 3, 1, 2)


def init_params(key, in_channel, out_channel):
    k1, k2, k3, k4, k5, k6 = jax.random.split(key, 6)
    return {
        # conv weights in HWIO layout (bias=False, matching the PyTorch module)
        "w1": 0.1 * jax.random.normal(k1, (3, 3, in_channel, out_channel), jnp.float32),
        "gamma1": 1.0 + 0.1 * jax.random.normal(k2, (out_channel,), jnp.float32),
        "beta1": 0.1 * jax.random.normal(k3, (out_channel,), jnp.float32),
        "w2": 0.1 * jax.random.normal(k4, (3, 3, out_channel, out_channel), jnp.float32),
        "gamma2": 1.0 + 0.1 * jax.random.normal(k5, (out_channel,), jnp.float32),
        "beta2": 0.1 * jax.random.normal(k6, (out_channel,), jnp.float32),
    }


if __name__ == "__main__":
    key = jax.random.PRNGKey(0)
    kx, kp = jax.random.split(key)

    N, Cin, H, W = 2, 4, 16, 16
    Cout = 8

    x = jax.random.normal(kx, (N, Cin, H, W), jnp.float32)   # NCHW, like PyTorch
    params = init_params(kp, Cin, Cout)

    out = jax.block_until_ready(double_conv(x, params))
    assert out.shape == (N, Cout, H, W), out.shape
    assert jnp.all(jnp.isfinite(out))
    print("KERNEL_OK")
</pallas_src>

<mosaic_0001>
module attributes {stable_mosaic.version = 11 : i64} {
  func.func @_double_conv_kernel(%arg0: memref<2x16x64xbf16, #tpu.memory_space<vmem>>, %arg1: memref<3x64x128xbf16, #tpu.memory_space<vmem>>, %arg2: memref<3x128x128xbf16, #tpu.memory_space<vmem>>, %arg3: memref<1x8xf32, #tpu.memory_space<vmem>>, %arg4: memref<1x8xf32, #tpu.memory_space<vmem>>, %arg5: memref<1x8xf32, #tpu.memory_space<vmem>>, %arg6: memref<1x8xf32, #tpu.memory_space<vmem>>, %arg7: memref<128x8xf32, #tpu.memory_space<vmem>>, %arg8: memref<8x128xf32, #tpu.memory_space<vmem>>, %arg9: memref<32x128xf32, #tpu.memory_space<vmem>>, %arg10: memref<2x18x64xf32, #tpu.memory_space<vmem>>, %arg11: memref<2x18x128xf32, #tpu.memory_space<vmem>>) attributes {dimension_semantics = [], scalar_prefetch = 0 : i64, scratch_operands = 2 : i64, tpu.core_type = #tpu.core_type<tc>} {
    %cst = arith.constant 0.000000e+00 : f32
    %0 = vector.broadcast %cst : f32 to vector<2x18x64xf32>
    %c0 = arith.constant 0 : index
    %c0_0 = arith.constant 0 : index
    %c0_1 = arith.constant 0 : index
    %1 = vector.load %arg10[%c0, %c0_0, %c0_1] : memref<2x18x64xf32, #tpu.memory_space<vmem>>, vector<2x18x64xf32>
    tpu.vector_store %arg10[%c0, %c0_0, %c0_1], %0 {strides = array<i32>} : memref<2x18x64xf32, #tpu.memory_space<vmem>>, vector<2x18x64xf32>,
    %c0_2 = arith.constant 0 : index
    %c0_3 = arith.constant 0 : index
    %c0_4 = arith.constant 0 : index
    %2 = vector.load %arg0[%c0_2, %c0_3, %c0_4] : memref<2x16x64xbf16, #tpu.memory_space<vmem>>, vector<2x16x64xbf16>
    %3 = arith.extf %2 : vector<2x16x64xbf16> to vector<2x16x64xf32>
    %c0_5 = arith.constant 0 : index
    %c1 = arith.constant 1 : index
    %c0_6 = arith.constant 0 : index
    %4 = vector.load %arg10[%c0_5, %c1, %c0_6] : memref<2x18x64xf32, #tpu.memory_space<vmem>>, vector<2x16x64xf32>
    tpu.vector_store %arg10[%c0_5, %c1, %c0_6], %3 {strides = array<i32>} : memref<2x18x64xf32, #tpu.memory_space<vmem>>, vector<2x16x64xf32>,
    %cst_7 = arith.constant 0.000000e+00 : f32
    %5 = vector.broadcast %cst_7 : f32 to vector<32x128xf32>
    %c0_8 = arith.constant 0 : index
    %c0_9 = arith.constant 0 : index
    %c0_10 = arith.constant 0 : index
    %6 = vector.load %arg10[%c0_8, %c0_9, %c0_10] : memref<2x18x64xf32, #tpu.memory_space<vmem>>, vector<2x16x64xf32>
    %7 = vector.shape_cast %6 : vector<2x16x64xf32> to vector<32x64xf32>
    %8 = arith.truncf %7 : vector<32x64xf32> to vector<32x64xbf16>
    %c0_11 = arith.constant 0 : index
    %c0_12 = arith.constant 0 : index
    %c0_13 = arith.constant 0 : index
    %9 = vector.load %arg1[%c0_11, %c0_12, %c0_13] : memref<3x64x128xbf16, #tpu.memory_space<vmem>>, vector<1x64x128xbf16>
    %10 = vector.shape_cast %9 : vector<1x64x128xbf16> to vector<64x128xbf16>
    %cst_14 = arith.constant dense<0.000000e+00> : vector<32x128xf32>
    %11 = tpu.matmul %8, %10, %cst_14 {dimension_numbers = #tpu.dot_dimension_numbers<[1], [0], [0], [1], [0, 0, 1, 1], [], []>} : vector<32x64xbf16>, vector<64x128xbf16>, vector<32x128xf32> -> vector<32x128xf32>
    %12 = arith.addf %5, %11 : vector<32x128xf32>
    %c0_15 = arith.constant 0 : index
    %c1_16 = arith.constant 1 : index
    %c0_17 = arith.constant 0 : index
    %13 = vector.load %arg10[%c0_15, %c1_16, %c0_17] : memref<2x18x64xf32, #tpu.memory_space<vmem>>, vector<2x16x64xf32>
    %14 = vector.shape_cast %13 : vector<2x16x64xf32> to vector<32x64xf32>
    %15 = arith.truncf %14 : vector<32x64xf32> to vector<32x64xbf16>
    %c1_18 = arith.constant 1 : index
    %c0_19 = arith.constant 0 : index
    %c0_20 = arith.constant 0 : index
    %16 = vector.load %arg1[%c1_18, %c0_19, %c0_20] : memref<3x64x128xbf16, #tpu.memory_space<vmem>>, vector<1x64x128xbf16>
    %17 = vector.shape_cast %16 : vector<1x64x128xbf16> to vector<64x128xbf16>
    %cst_21 = arith.constant dense<0.000000e+00> : vector<32x128xf32>
    %18 = tpu.matmul %15, %17, %cst_21 {dimension_numbers = #tpu.dot_dimension_numbers<[1], [0], [0], [1], [0, 0, 1, 1], [], []>} : vector<32x64xbf16>, vector<64x128xbf16>, vector<32x128xf32> -> vector<32x128xf32>
    %19 = arith.addf %12, %18 : vector<32x128xf32>
    %c0_22 = arith.constant 0 : index
    %c2 = arith.constant 2 : index
    %c0_23 = arith.constant 0 : index
    %20 = vector.load %arg10[%c0_22, %c2, %c0_23] : memref<2x18x64xf32, #tpu.memory_space<vmem>>, vector<2x16x64xf32>
    %21 = vector.shape_cast %20 : vector<2x16x64xf32> to vector<32x64xf32>
    %22 = arith.truncf %21 : vector<32x64xf32> to vector<32x64xbf16>
    %c2_24 = arith.constant 2 : index
    %c0_25 = arith.constant 0 : index
    %c0_26 = arith.constant 0 : index
    %23 = vector.load %arg1[%c2_24, %c0_25, %c0_26] : memref<3x64x128xbf16, #tpu.memory_space<vmem>>, vector<1x64x128xbf16>
    %24 = vector.shape_cast %23 : vector<1x64x128xbf16> to vector<64x128xbf16>
    %cst_27 = arith.constant dense<0.000000e+00> : vector<32x128xf32>
    %25 = tpu.matmul %22, %24, %cst_27 {dimension_numbers = #tpu.dot_dimension_numbers<[1], [0], [0], [1], [0, 0, 1, 1], [], []>} : vector<32x64xbf16>, vector<64x128xbf16>, vector<32x128xf32> -> vector<32x128xf32>
    %26 = arith.addf %19, %25 : vector<32x128xf32>
    %c0_28 = arith.constant 0 : index
    %c0_29 = arith.constant 0 : index
    %27 = vector.load %arg3[%c0_28, %c0_29] : memref<1x8xf32, #tpu.memory_space<vmem>>, vector<1x8xf32>
    %c0_30 = arith.constant 0 : index
    %c0_31 = arith.constant 0 : index
    %28 = vector.load %arg4[%c0_30, %c0_31] : memref<1x8xf32, #tpu.memory_space<vmem>>, vector<1x8xf32>
    %cst_32 = arith.constant dense<0.000000e+00> : vector<128xf32>
    %29 = vector.multi_reduction <add>, %26, %cst_32 [0] : vector<32x128xf32> to vector<128xf32>
    %30 = vector.shape_cast %29 : vector<128xf32> to vector<1x128xf32>
    %c0_33 = arith.constant 0 : index
    %c0_34 = arith.constant 0 : index
    %31 = vector.load %arg7[%c0_33, %c0_34] : memref<128x8xf32, #tpu.memory_space<vmem>>, vector<128x8xf32>
    %cst_35 = arith.constant dense<0.000000e+00> : vector<1x8xf32>
    %32 = tpu.matmul %30, %31, %cst_35 {dimension_numbers = #tpu.dot_dimension_numbers<[1], [0], [0], [1], [0, 0, 1, 1], [], []>} : vector<1x128xf32>, vector<128x8xf32>, vector<1x8xf32> -> vector<1x8xf32>
    %cst_36 = arith.constant 0.001953125 : f32
    %33 = vector.broadcast %cst_36 : f32 to vector<1x8xf32>
    %34 = arith.mulf %32, %33 : vector<1x8xf32>
    %c0_37 = arith.constant 0 : index
    %c0_38 = arith.constant 0 : index
    %35 = vector.load %arg8[%c0_37, %c0_38] : memref<8x128xf32, #tpu.memory_space<vmem>>, vector<8x128xf32>
    %cst_39 = arith.constant dense<0.000000e+00> : vector<1x128xf32>
    %36 = tpu.matmul %34, %35, %cst_39 {dimension_numbers = #tpu.dot_dimension_numbers<[1], [0], [0], [1], [0, 0, 1, 1], [], []>} : vector<1x8xf32>, vector<8x128xf32>, vector<1x128xf32> -> vector<1x128xf32>
    %37 = vector.broadcast %36 : vector<1x128xf32> to vector<32x128xf32>
    %38 = arith.subf %26, %37 : vector<32x128xf32>
    %39 = arith.mulf %38, %38 : vector<32x128xf32>
    %cst_40 = arith.constant dense<0.000000e+00> : vector<128xf32>
    %40 = vector.multi_reduction <add>, %39, %cst_40 [0] : vector<32x128xf32> to vector<128xf32>
    %41 = vector.shape_cast %40 : vector<128xf32> to vector<1x128xf32>
    %c0_41 = arith.constant 0 : index
    %c0_42 = arith.constant 0 : index
    %42 = vector.load %arg7[%c0_41, %c0_42] : memref<128x8xf32, #tpu.memory_space<vmem>>, vector<128x8xf32>
    %cst_43 = arith.constant dense<0.000000e+00> : vector<1x8xf32>
    %43 = tpu.matmul %41, %42, %cst_43 {dimension_numbers = #tpu.dot_dimension_numbers<[1], [0], [0], [1], [0, 0, 1, 1], [], []>} : vector<1x128xf32>, vector<128x8xf32>, vector<1x8xf32> -> vector<1x8xf32>
    %cst_44 = arith.constant 0.001953125 : f32
    %44 = vector.broadcast %cst_44 : f32 to vector<1x8xf32>
    %45 = arith.mulf %43, %44 : vector<1x8xf32>
    %cst_45 = arith.constant 9.99999974E-6 : f32
    %46 = vector.broadcast %cst_45 : f32 to vector<1x8xf32>
    %47 = arith.addf %45, %46 : vector<1x8xf32>
    %48 = math.rsqrt %47 : vector<1x8xf32>
    %49 = arith.mulf %27, %48 : vector<1x8xf32>
    %c0_46 = arith.constant 0 : index
    %c0_47 = arith.constant 0 : index
    %50 = vector.load %arg8[%c0_46, %c0_47] : memref<8x128xf32, #tpu.memory_space<vmem>>, vector<8x128xf32>
    %cst_48 = arith.constant dense<0.000000e+00> : vector<1x128xf32>
    %51 = tpu.matmul %49, %50, %cst_48 {dimension_numbers = #tpu.dot_dimension_numbers<[1], [0], [0], [1], [0, 0, 1, 1], [], []>} : vector<1x8xf32>, vector<8x128xf32>, vector<1x128xf32> -> vector<1x128xf32>
    %c0_49 = arith.constant 0 : index
    %c0_50 = arith.constant 0 : index
    %52 = vector.load %arg8[%c0_49, %c0_50] : memref<8x128xf32, #tpu.memory_space<vmem>>, vector<8x128xf32>
    %cst_51 = arith.constant dense<0.000000e+00> : vector<1x128xf32>
    %53 = tpu.matmul %28, %52, %cst_51 {dimension_numbers = #tpu.dot_dimension_numbers<[1], [0], [0], [1], [0, 0, 1, 1], [], []>} : vector<1x8xf32>, vector<8x128xf32>, vector<1x128xf32> -> vector<1x128xf32>
    %54 = vector.broadcast %51 : vector<1x128xf32> to vector<32x128xf32>
    %55 = arith.mulf %38, %54 : vector<32x128xf32>
    %56 = vector.broadcast %53 : vector<1x128xf32> to vector<32x128xf32>
    %57 = arith.addf %55, %56 : vector<32x128xf32>
    %cst_52 = arith.constant 0.000000e+00 : f32
    %58 = vector.broadcast %cst_52 : f32 to vector<32x128xf32>
    %59 = arith.cmpf oge, %57, %58 : vector<32x128xf32>
    %cst_53 = arith.constant 0.00999999977 : f32
    %60 = vector.broadcast %cst_53 : f32 to vector<32x128xf32>
    %61 = arith.mulf %60, %57 : vector<32x128xf32>
    %62 = arith.select %59, %57, %61 : vector<32x128xi1>, vector<32x128xf32>
    %cst_54 = arith.constant 0.000000e+00 : f32
    %63 = vector.broadcast %cst_54 : f32 to vector<2x18x128xf32>
    %c0_55 = arith.constant 0 : index
    %c0_56 = arith.constant 0 : index
    %c0_57 = arith.constant 0 : index
    %64 = vector.load %arg11[%c0_55, %c0_56, %c0_57] : memref<2x18x128xf32, #tpu.memory_space<vmem>>, vector<2x18x128xf32>
    tpu.vector_store %arg11[%c0_55, %c0_56, %c0_57], %63 {strides = array<i32>} : memref<2x18x128xf32, #tpu.memory_space<vmem>>, vector<2x18x128xf32>,
    %65 = vector.shape_cast %62 : vector<32x128xf32> to vector<2x16x128xf32>
    %c0_58 = arith.constant 0 : index
    %c1_59 = arith.constant 1 : index
    %c0_60 = arith.constant 0 : index
    %66 = vector.load %arg11[%c0_58, %c1_59, %c0_60] : memref<2x18x128xf32, #tpu.memory_space<vmem>>, vector<2x16x128xf32>
    tpu.vector_store %arg11[%c0_58, %c1_59, %c0_60], %65 {strides = array<i32>} : memref<2x18x128xf32, #tpu.memory_space<vmem>>, vector<2x16x128xf32>,
    %cst_61 = arith.constant 0.000000e+00 : f32
    %67 = vector.broadcast %cst_61 : f32 to vector<32x128xf32>
    %c0_62 = arith.constant 0 : index
    %c0_63 = arith.constant 0 : index
    %c0_64 = arith.constant 0 : index
    %68 = vector.load %arg11[%c0_62, %c0_63, %c0_64] : memref<2x18x128xf32, #tpu.memory_space<vmem>>, vector<2x16x128xf32>
    %69 = vector.shape_cast %68 : vector<2x16x128xf32> to vector<32x128xf32>
    %70 = arith.truncf %69 : vector<32x128xf32> to vector<32x128xbf16>
    %c0_65 = arith.constant 0 : index
    %c0_66 = arith.constant 0 : index
    %c0_67 = arith.constant 0 : index
    %71 = vector.load %arg2[%c0_65, %c0_66, %c0_67] : memref<3x128x128xbf16, #tpu.memory_space<vmem>>, vector<1x128x128xbf16>
    %72 = vector.shape_cast %71 : vector<1x128x128xbf16> to vector<128x128xbf16>
    %cst_68 = arith.constant dense<0.000000e+00> : vector<32x128xf32>
    %73 = tpu.matmul %70, %72, %cst_68 {dimension_numbers = #tpu.dot_dimension_numbers<[1], [0], [0], [1], [0, 0, 1, 1], [], []>} : vector<32x128xbf16>, vector<128x128xbf16>, vector<32x128xf32> -> vector<32x128xf32>
    %74 = arith.addf %67, %73 : vector<32x128xf32>
    %c0_69 = arith.constant 0 : index
    %c1_70 = arith.constant 1 : index
    %c0_71 = arith.constant 0 : index
    %75 = vector.load %arg11[%c0_69, %c1_70, %c0_71] : memref<2x18x128xf32, #tpu.memory_space<vmem>>, vector<2x16x128xf32>
    %76 = vector.shape_cast %75 : vector<2x16x128xf32> to vector<32x128xf32>
    %77 = arith.truncf %76 : vector<32x128xf32> to vector<32x128xbf16>
    %c1_72 = arith.constant 1 : index
    %c0_73 = arith.constant 0 : index
    %c0_74 = arith.constant 0 : index
    %78 = vector.load %arg2[%c1_72, %c0_73, %c0_74] : memref<3x128x128xbf16, #tpu.memory_space<vmem>>, vector<1x128x128xbf16>
    %79 = vector.shape_cast %78 : vector<1x128x128xbf16> to vector<128x128xbf16>
    %cst_75 = arith.constant dense<0.000000e+00> : vector<32x128xf32>
    %80 = tpu.matmul %77, %79, %cst_75 {dimension_numbers = #tpu.dot_dimension_numbers<[1], [0], [0], [1], [0, 0, 1, 1], [], []>} : vector<32x128xbf16>, vector<128x128xbf16>, vector<32x128xf32> -> vector<32x128xf32>
    %81 = arith.addf %74, %80 : vector<32x128xf32>
    %c0_76 = arith.constant 0 : index
    %c2_77 = arith.constant 2 : index
    %c0_78 = arith.constant 0 : index
    %82 = vector.load %arg11[%c0_76, %c2_77, %c0_78] : memref<2x18x128xf32, #tpu.memory_space<vmem>>, vector<2x16x128xf32>
    %83 = vector.shape_cast %82 : vector<2x16x128xf32> to vector<32x128xf32>
    %84 = arith.truncf %83 : vector<32x128xf32> to vector<32x128xbf16>
    %c2_79 = arith.constant 2 : index
    %c0_80 = arith.constant 0 : index
    %c0_81 = arith.constant 0 : index
    %85 = vector.load %arg2[%c2_79, %c0_80, %c0_81] : memref<3x128x128xbf16, #tpu.memory_space<vmem>>, vector<1x128x128xbf16>
    %86 = vector.shape_cast %85 : vector<1x128x128xbf16> to vector<128x128xbf16>
    %cst_82 = arith.constant dense<0.000000e+00> : vector<32x128xf32>
    %87 = tpu.matmul %84, %86, %cst_82 {dimension_numbers = #tpu.dot_dimension_numbers<[1], [0], [0], [1], [0, 0, 1, 1], [], []>} : vector<32x128xbf16>, vector<128x128xbf16>, vector<32x128xf32> -> vector<32x128xf32>
    %88 = arith.addf %81, %87 : vector<32x128xf32>
    %c0_83 = arith.constant 0 : index
    %c0_84 = arith.constant 0 : index
    %89 = vector.load %arg5[%c0_83, %c0_84] : memref<1x8xf32, #tpu.memory_space<vmem>>, vector<1x8xf32>
    %c0_85 = arith.constant 0 : index
    %c0_86 = arith.constant 0 : index
    %90 = vector.load %arg6[%c0_85, %c0_86] : memref<1x8xf32, #tpu.memory_space<vmem>>, vector<1x8xf32>
    %cst_87 = arith.constant dense<0.000000e+00> : vector<128xf32>
    %91 = vector.multi_reduction <add>, %88, %cst_87 [0] : vector<32x128xf32> to vector<128xf32>
    %92 = vector.shape_cast %91 : vector<128xf32> to vector<1x128xf32>
    %c0_88 = arith.constant 0 : index
    %c0_89 = arith.constant 0 : index
    %93 = vector.load %arg7[%c0_88, %c0_89] : memref<128x8xf32, #tpu.memory_space<vmem>>, vector<128x8xf32>
    %cst_90 = arith.constant dense<0.000000e+00> : vector<1x8xf32>
    %94 = tpu.matmul %92, %93, %cst_90 {dimension_numbers = #tpu.dot_dimension_numbers<[1], [0], [0], [1], [0, 0, 1, 1], [], []>} : vector<1x128xf32>, vector<128x8xf32>, vector<1x8xf32> -> vector<1x8xf32>
    %cst_91 = arith.constant 0.001953125 : f32
    %95 = vector.broadcast %cst_91 : f32 to vector<1x8xf32>
    %96 = arith.mulf %94, %95 : vector<1x8xf32>
    %c0_92 = arith.constant 0 : index
    %c0_93 = arith.constant 0 : index
    %97 = vector.load %arg8[%c0_92, %c0_93] : memref<8x128xf32, #tpu.memory_space<vmem>>, vector<8x128xf32>
    %cst_94 = arith.constant dense<0.000000e+00> : vector<1x128xf32>
    %98 = tpu.matmul %96, %97, %cst_94 {dimension_numbers = #tpu.dot_dimension_numbers<[1], [0], [0], [1], [0, 0, 1, 1], [], []>} : vector<1x8xf32>, vector<8x128xf32>, vector<1x128xf32> -> vector<1x128xf32>
    %99 = vector.broadcast %98 : vector<1x128xf32> to vector<32x128xf32>
    %100 = arith.subf %88, %99 : vector<32x128xf32>
    %101 = arith.mulf %100, %100 : vector<32x128xf32>
    %cst_95 = arith.constant dense<0.000000e+00> : vector<128xf32>
    %102 = vector.multi_reduction <add>, %101, %cst_95 [0] : vector<32x128xf32> to vector<128xf32>
    %103 = vector.shape_cast %102 : vector<128xf32> to vector<1x128xf32>
    %c0_96 = arith.constant 0 : index
    %c0_97 = arith.constant 0 : index
    %104 = vector.load %arg7[%c0_96, %c0_97] : memref<128x8xf32, #tpu.memory_space<vmem>>, vector<128x8xf32>
    %cst_98 = arith.constant dense<0.000000e+00> : vector<1x8xf32>
    %105 = tpu.matmul %103, %104, %cst_98 {dimension_numbers = #tpu.dot_dimension_numbers<[1], [0], [0], [1], [0, 0, 1, 1], [], []>} : vector<1x128xf32>, vector<128x8xf32>, vector<1x8xf32> -> vector<1x8xf32>
    %cst_99 = arith.constant 0.001953125 : f32
    %106 = vector.broadcast %cst_99 : f32 to vector<1x8xf32>
    %107 = arith.mulf %105, %106 : vector<1x8xf32>
    %cst_100 = arith.constant 9.99999974E-6 : f32
    %108 = vector.broadcast %cst_100 : f32 to vector<1x8xf32>
    %109 = arith.addf %107, %108 : vector<1x8xf32>
    %110 = math.rsqrt %109 : vector<1x8xf32>
    %111 = arith.mulf %89, %110 : vector<1x8xf32>
    %c0_101 = arith.constant 0 : index
    %c0_102 = arith.constant 0 : index
    %112 = vector.load %arg8[%c0_101, %c0_102] : memref<8x128xf32, #tpu.memory_space<vmem>>, vector<8x128xf32>
    %cst_103 = arith.constant dense<0.000000e+00> : vector<1x128xf32>
    %113 = tpu.matmul %111, %112, %cst_103 {dimension_numbers = #tpu.dot_dimension_numbers<[1], [0], [0], [1], [0, 0, 1, 1], [], []>} : vector<1x8xf32>, vector<8x128xf32>, vector<1x128xf32> -> vector<1x128xf32>
    %c0_104 = arith.constant 0 : index
    %c0_105 = arith.constant 0 : index
    %114 = vector.load %arg8[%c0_104, %c0_105] : memref<8x128xf32, #tpu.memory_space<vmem>>, vector<8x128xf32>
    %cst_106 = arith.constant dense<0.000000e+00> : vector<1x128xf32>
    %115 = tpu.matmul %90, %114, %cst_106 {dimension_numbers = #tpu.dot_dimension_numbers<[1], [0], [0], [1], [0, 0, 1, 1], [], []>} : vector<1x8xf32>, vector<8x128xf32>, vector<1x128xf32> -> vector<1x128xf32>
    %116 = vector.broadcast %113 : vector<1x128xf32> to vector<32x128xf32>
    %117 = arith.mulf %100, %116 : vector<32x128xf32>
    %118 = vector.broadcast %115 : vector<1x128xf32> to vector<32x128xf32>
    %119 = arith.addf %117, %118 : vector<32x128xf32>
    %cst_107 = arith.constant 0.000000e+00 : f32
    %120 = vector.broadcast %cst_107 : f32 to vector<32x128xf32>
    %121 = arith.cmpf oge, %119, %120 : vector<32x128xf32>
    %cst_108 = arith.constant 0.00999999977 : f32
    %122 = vector.broadcast %cst_108 : f32 to vector<32x128xf32>
    %123 = arith.mulf %122, %119 : vector<32x128xf32>
    %124 = arith.select %121, %119, %123 : vector<32x128xi1>, vector<32x128xf32>
    %c0_109 = arith.constant 0 : index
    %c0_110 = arith.constant 0 : index
    %125 = vector.load %arg9[%c0_109, %c0_110] : memref<32x128xf32, #tpu.memory_space<vmem>>, vector<32x128xf32>
    tpu.vector_store %arg9[%c0_109, %c0_110], %124 {strides = array<i32>} : memref<32x128xf32, #tpu.memory_space<vmem>>, vector<32x128xf32>,
    return
  }
}

</mosaic_0001>

<bundles_post_ra>
// kernel: tile.9
= control target key start
LH: loop header
LB: loop body
LE: loop exit
PB: predicated region body
PF: predicated region fallthrough
CT: control target
= control target key end

     0   :  { %vm6_vm0 = vcmask 1043458   ;;  %vm10_vm1 = vcmask 1045508   ;;  %vm14_vm2 = vcmask 1047558   ;;  %s19_s6 = smov 3  ;;  %s22_s7 = smov 12  ;;  %vm16_vm3 = vcmask 64512   ;;  %s736_s0 = inlined_call_operand.vmem [shape: f32[16,8,8], index: 0, kind: input, shape index: {}]   ;;  %s737_s1 = inlined_call_operand.vmem [shape: f32[128,8], index: 1, kind: output, shape index: {}]  }
   0x1   :  { %v348_v0 = vld [vmem:[%s736_s0 + $0xf] ss:$16 sm:%s19_s6]   ;;  %s27_s12 = smov 48  ;;  %s32_s13 = smov 192  ;;  %vm38_vm4 = vcmask 1048512   ;;  %vm60_vm5 = vcmask 982912  }
   0x2   :  { %v349_v1 = vld [vmem:[%s736_s0 + $0xf] ss:$16 sm:%s22_s7]   ;;  %s63_s18 = smov 3  ;;  %s66_s21 = smov 12  ;;  %vm82_vm6 = vcmask 917312   ;;  %vm104_vm7 = vcmask 851712  }
   0x3   :  { %v25_v2 = vsel %vm6_vm0, %v349_v1, %v348_v0  ;;  %v350_v3 = vld [vmem:[%s736_s0 + $0xf] ss:$16 sm:%s27_s12]   ;;  %v356_v6 = vld [vmem:[%s736_s0 + $0xd] ss:$16 sm:%s63_s18]   ;;  %s71_s22 = smov 48  ;;  %s76_s27 = smov 192 }
   0x4   :  { %v351_v4 = vld [vmem:[%s736_s0 + $0xf] ss:$16 sm:%s32_s13]   ;;  %v30_v5 = vsel %vm10_vm1, %v350_v3, %v25_v2  ;;  %v357_v8 = vld [vmem:[%s736_s0 + $0xd] ss:$16 sm:%s66_s21]   ;;  %s423_s28 = smov 120   ;;  %s41_s2 = smov 3 }
   0x5   :  { %v35_v7 = vsel %vm14_vm2, %v351_v4, %v30_v5  ;;  %v358_v9 = vld [vmem:[%s736_s0 + $0xd] ss:$16 sm:%s71_s22]   ;;  %v69_v10 = vsel %vm6_vm0, %v357_v8, %v356_v6  ;;  %s44_s3 = smov 12  ;;  %v352_v13 = vld [vmem:[%s736_s0 + $0xe] ss:$16 sm:%s41_s2]   ;;  %s49_s8 = smov 48 }
   0x6   :  { %36 = vrot.lane.b32.xlu0 %v35_v7, %s423_s28  ;;  %v359_v11 = vld [vmem:[%s736_s0 + $0xd] ss:$16 sm:%s76_s27]   ;;  %v74_v12 = vsel %vm10_vm1, %v358_v9, %v69_v10  ;;  %s54_s9 = smov 192  ;;  %s85_s14 = smov 3  ;;  %vm126_vm8 = vcmask 786112   ;;  %vm148_vm9 = vcmask 720512  }
   0x7   :  { %v353_v14 = vld [vmem:[%s736_s0 + $0xe] ss:$16 sm:%s44_s3]   ;;  %v79_v15 = vsel %vm14_vm2, %v359_v11, %v74_v12  ;;  %s424_s15 = smov 104   ;;  %v360_v20 = vld [vmem:[%s736_s0 + $0xc] ss:$16 sm:%s85_s14]   ;;  %s88_s18 = smov 12 }
   0x8   :  { %v47_v16 = vsel %vm6_vm0, %v353_v14, %v352_v13  ;;  %v354_v17 = vld [vmem:[%s736_s0 + $0xe] ss:$16 sm:%s49_s8]   ;;  %80 = vrot.lane.b32.xlu1 %v79_v15, %s424_s15  ;;  %s93_s19 = smov 48  ;;  %s98_s24 = smov 192  ;;  %vm170_vm10 = vcmask 654912   ;;  %vm192_vm11 = vcmask 589312  }
   0x9   :  { %v355_v18 = vld [vmem:[%s736_s0 + $0xe] ss:$16 sm:%s54_s9]   ;;  %v52_v19 = vsel %vm10_vm1, %v354_v17, %v47_v16  ;;  %v361_v21 = vld [vmem:[%s736_s0 + $0xc] ss:$16 sm:%s88_s18]   ;;  %s151_s27 = smov 3  ;;  %s154_s28 = smov 12 }
   0xa   :  { %v362_v22 = vld [vmem:[%s736_s0 + $0xc] ss:$16 sm:%s93_s19]   ;;  %v57_v23 = vsel %vm14_vm2, %v355_v18, %v52_v19  ;;  %v91_v24 = vsel %vm6_vm0, %v361_v21, %v360_v20  ;;  %v372_v27 = vld [vmem:[%s736_s0 + $0x9] ss:$16 sm:%s151_s27]   ;;  %s159_s4 = smov 48  ;;  %s164_s7 = smov 192 }
   0xb   :  { %v363_v25 = vld [vmem:[%s736_s0 + $0xc] ss:$16 sm:%s98_s24]   ;;  %v96_v26 = vsel %vm10_vm1, %v362_v22, %v91_v24  ;;  %v373_v28 = vld [vmem:[%s736_s0 + $0x9] ss:$16 sm:%s154_s28]   ;;  %s173_s8 = smov 3  ;;  %s425_s9 = smov 112  }
   0xc   :  { %v157_v29 = vsel %vm6_vm0, %v373_v28, %v372_v27  ;;  %v374_v30 = vld [vmem:[%s736_s0 + $0x9] ss:$16 sm:%s159_s4]   ;;  %v101_v31 = vsel %vm14_vm2, %v363_v25, %v96_v26  ;;  %v376_v32 = vld [vmem:[%s736_s0 + $0x8] ss:$16 sm:%s173_s8]   ;;  %s176_s12 = smov 12  ;;  %s181_s13 = smov 48 }
   0xd   :  { %v377_v33 = vld [vmem:[%s736_s0 + $0x8] ss:$16 sm:%s176_s12]   ;;  %s186_s16 = smov 192  ;;  %v162_v34 = vsel %vm10_vm1, %v374_v30, %v157_v29  ;;  %v375_v35 = vld [vmem:[%s736_s0 + $0x9] ss:$16 sm:%s164_s7]   ;;  %s217_s21 = smov 3 }
   0xe   :  { %58 = vrot.lane.b32.xlu0 %v57_v23, %s425_s9  ;;  %v179_v36 = vsel %vm6_vm0, %v377_v33, %v376_v32  ;;  %v378_v37 = vld [vmem:[%s736_s0 + $0x8] ss:$16 sm:%s181_s13]   ;;  %s220_s22 = smov 12  ;;  %s426_s23 = smov 96   ;;  %v167_v40 = vsel %vm14_vm2, %v375_v35, %v162_v34  ;;  %vm214_vm12 = vcmask 523712   ;;  %vm236_vm13 = vcmask 458112  }
   0xf   :  { %s225_s24 = smov 48  ;;  %v384_v38 = vld [vmem:[%s736_s0 + $0x6] ss:$16 sm:%s217_s21]   ;;  %s239_s29 = smov 3  ;;  %v184_v41 = vsel %vm10_vm1, %v378_v37, %v179_v36  ;;  %v379_v42 = vld [vmem:[%s736_s0 + $0x8] ss:$16 sm:%s186_s16]  }
  0x10   :  { %102 = vrot.lane.b32.xlu1 %v101_v31, %s426_s23  ;;  %v385_v39 = vld [vmem:[%s736_s0 + $0x6] ss:$16 sm:%s220_s22]   ;;  %s230_s3 = smov 192  ;;  %s242_s4 = smov 12  ;;  %v189_v47 = vsel %vm14_vm2, %v379_v42, %v184_v41  ;;  %vm258_vm14 = vcmask 392512   ;;  %vm280_vm15 = vcmask 326912  }
  0x11   :  { %v386_v43 = vld [vmem:[%s736_s0 + $0x6] ss:$16 sm:%s225_s24]   ;;  %s247_s7 = smov 48  ;;  %v223_v44 = vsel %vm6_vm0, %v385_v39, %v384_v38  ;;  %v388_v45 = vld [vmem:[%s736_s0 + $0x5] ss:$16 sm:%s239_s29]   ;;  %s107_s12 = smov 3 }
  0x12   :  { %v389_v46 = vld [vmem:[%s736_s0 + $0x5] ss:$16 sm:%s242_s4]   ;;  %s110_s13 = smov 12  ;;  %s427_s14 = smov 72   ;;  %v387_v48 = vld [vmem:[%s736_s0 + $0x6] ss:$16 sm:%s230_s3]   ;;  %v228_v52 = vsel %vm10_vm1, %v386_v43, %v223_v44 }
  0x13   :  { %v364_v49 = vld [vmem:[%s736_s0 + $0xb] ss:$16 sm:%s107_s12]   ;;  %s115_s19 = smov 48  ;;  %s120_s20 = smov 192  ;;  %v245_v53 = vsel %vm6_vm0, %v389_v46, %v388_v45  ;;  %v390_v54 = vld [vmem:[%s736_s0 + $0x5] ss:$16 sm:%s247_s7]   ;;  %v233_v61 = vsel %vm14_vm2, %v387_v48, %v228_v52 }
  0x14   :  { %s252_s21 = smov 192  ;;  %v365_v50 = vld [vmem:[%s736_s0 + $0xb] ss:$16 sm:%s110_s13]   ;;  %s283_s26 = smov 3  ;;  %v250_v62 = vsel %vm10_vm1, %v390_v54, %v245_v53 }
  0x15   :  { %v366_v51 = vld [vmem:[%s736_s0 + $0xb] ss:$16 sm:%s115_s19]   ;;  %v113_v55 = vsel %vm6_vm0, %v365_v50, %v364_v49  ;;  %s286_s2 = smov 12  ;;  %s428_s3 = smov 64   ;;  %v396_v59 = vld [vmem:[%s736_s0 + $0x3] ss:$16 sm:%s283_s26]  }
  0x16   :  { %168 = vrot.lane.b32.xlu0 %v167_v40, %s427_s14  ;;  %v367_v56 = vld [vmem:[%s736_s0 + $0xb] ss:$16 sm:%s120_s20]   ;;  %v118_v57 = vsel %vm10_vm1, %v366_v51, %v113_v55  ;;  %s291_s4 = smov 48  ;;  %s305_s9 = smov 3 }
  0x17   :  { %v123_v58 = vsel %vm14_vm2, %v367_v56, %v118_v57  ;;  %v397_v60 = vld [vmem:[%s736_s0 + $0x3] ss:$16 sm:%s286_s2]   ;;  %s308_s10 = smov 12  ;;  %v391_v63 = vld [vmem:[%s736_s0 + $0x5] ss:$16 sm:%s252_s21]   ;;  %s429_s13 = smov 88  }
  0x18   :  { %190 = vrot.lane.b32.xlu1 %v189_v47, %s428_s3  ;;  %124 = vrot.lane.b32.xlu2 %v123_v58, %s429_s13  ;;  %s296_s14 = smov 192  ;;  %s313_s15 = smov 48  ;;  %v398_v0 = vld [vmem:[%s736_s0 + $0x3] ss:$16 sm:%s291_s4]   ;;  %v289_v2 = vsel %vm6_vm0, %v397_v60, %v396_v59  ;;  %v255_v5 = vsel %vm14_vm2, %v391_v63, %v250_v62 }
  0x19   :  { %v400_v1 = vld [vmem:[%s736_s0 + $0x2] ss:$16 sm:%s305_s9]   ;;  %s129_s20 = smov 3  ;;  %s132_s25 = smov 12  ;;  %v399_v6 = vld [vmem:[%s736_s0 + $0x3] ss:$16 sm:%s296_s14]   ;;  %v294_v12 = vsel %vm10_vm1, %v398_v0, %v289_v2 }
  0x1a   :  { %v401_v3 = vld [vmem:[%s736_s0 + $0x2] ss:$16 sm:%s308_s10]   ;;  %v368_v4 = vld [vmem:[%s736_s0 + $0xa] ss:$16 sm:%s129_s20]   ;;  %s137_s26 = smov 48  ;;  %s430_s27 = smov 48   ;;  %v299_v20 = vsel %vm14_vm2, %v399_v6, %v294_v12 }
  0x1b   :  { %v402_v7 = vld [vmem:[%s736_s0 + $0x2] ss:$16 sm:%s313_s15]   ;;  %s318_s3 = smov 192  ;;  %v369_v8 = vld [vmem:[%s736_s0 + $0xa] ss:$16 sm:%s132_s25]   ;;  %s142_s6 = smov 192  ;;  %v311_v13 = vsel %vm6_vm0, %v401_v3, %v400_v1 }
  0x1c   :  { %v135_v9 = vsel %vm6_vm0, %v369_v8, %v368_v4  ;;  %v370_v10 = vld [vmem:[%s736_s0 + $0xa] ss:$16 sm:%s137_s26]   ;;  %s195_s11 = smov 3  ;;  %s198_s12 = smov 12  ;;  %v316_v21 = vsel %vm10_vm1, %v402_v7, %v311_v13  ;;  %v403_v22 = vld [vmem:[%s736_s0 + $0x2] ss:$16 sm:%s318_s3]  }
  0x1d   :  { %v371_v11 = vld [vmem:[%s736_s0 + $0xa] ss:$16 sm:%s142_s6]   ;;  %v140_v14 = vsel %vm10_vm1, %v370_v10, %v135_v9  ;;  %v380_v15 = vld [vmem:[%s736_s0 + $0x7] ss:$16 sm:%s195_s11]   ;;  %s203_s17 = smov 48  ;;  %s431_s18 = smov 40   ;;  %v321_v25 = vsel %vm14_vm2, %v403_v22, %v316_v21 }
  0x1e   :  { %234 = vrot.lane.b32.xlu0 %v233_v61, %s430_s27  ;;  %v381_v16 = vld [vmem:[%s736_s0 + $0x7] ss:$16 sm:%s198_s12]   ;;  %v145_v17 = vsel %vm14_vm2, %v371_v11, %v140_v14  ;;  %s208_s21 = smov 192  ;;  %s432_s24 = smov 80  }
  0x1f   :  { %v201_v18 = vsel %vm6_vm0, %v381_v16, %v380_v15  ;;  %v382_v19 = vld [vmem:[%s736_s0 + $0x7] ss:$16 sm:%s203_s17]   ;;  %s261_s25 = smov 3  ;;  %s264_s26 = smov 12 }
  0x20   :  { %256 = vrot.lane.b32.xlu1 %v255_v5, %s431_s18  ;;  %146 = vrot.lane.b32.xlu2 %v145_v17, %s432_s24  ;;  %v206_v23 = vsel %vm10_vm1, %v382_v19, %v201_v18  ;;  %v383_v24 = vld [vmem:[%s736_s0 + $0x7] ss:$16 sm:%s208_s21]   ;;  %s433_s29 = smov 24   ;;  %s269_s5 = smov 48 }
  0x21   :  { %v392_v26 = vld [vmem:[%s736_s0 + $0x4] ss:$16 sm:%s261_s25]   ;;  %v211_v28 = vsel %vm14_vm2, %v383_v24, %v206_v23  ;;  %s434_s6 = smov 16   ;;  %s274_s9 = smov 192 }
  0x22   :  { %v393_v27 = vld [vmem:[%s736_s0 + $0x4] ss:$16 sm:%s264_s26]   ;;  %s435_s10 = smov 56   ;;  %s327_s11 = smov 3 }
  0x23   :  { %v267_v29 = vsel %vm6_vm0, %v393_v27, %v392_v26  ;;  %v394_v30 = vld [vmem:[%s736_s0 + $0x4] ss:$16 sm:%s269_s5]   ;;  %s330_s12 = smov 12  ;;  %v404_v33 = vld [vmem:[%s736_s0 + $0x1] ss:$16 sm:%s327_s11]   ;;  %s335_s19 = smov 48 }
  0x24   :  { %v272_v31 = vsel %vm10_vm1, %v394_v30, %v267_v29  ;;  %v395_v32 = vld [vmem:[%s736_s0 + $0x4] ss:$16 sm:%s274_s9]   ;;  %v405_v34 = vld [vmem:[%s736_s0 + $0x1] ss:$16 sm:%s330_s12]   ;;  %s340_s22 = smov 192  ;;  %s436_s23 = smov 32  }
  0x25   :  { %v277_v35 = vsel %vm14_vm2, %v395_v32, %v272_v31  ;;  %v333_v36 = vsel %vm6_vm0, %v405_v34, %v404_v33  ;;  %v406_v37 = vld [vmem:[%s736_s0 + $0x1] ss:$16 sm:%s335_s19]   ;;  %s437_s26 = smov 8   ;;  %s2_s27 = smov 3 }
  0x26   :  { %300 = vrot.lane.b32.xlu0 %v299_v20, %s433_s29  ;;  %v338_v38 = vsel %vm10_vm1, %v406_v37, %v333_v36  ;;  %v407_v39 = vld [vmem:[%s736_s0 + $0x1] ss:$16 sm:%s340_s22]   ;;  %s4_s28 = smov 12  ;;  %s8_s29 = smov 48 }
  0x27   :  { %v343_v40 = vsel %vm14_vm2, %v407_v39, %v338_v38  ;;  %s12_s30 = smov 192  ;;  %v3_v41 = vld [vmem:[%s736_s0] ss:$16 sm:%s2_s27]  }
  0x28   :  { %322 = vrot.lane.b32.xlu1 %v321_v25, %s434_s6  ;;  %212 = vrot.lane.b32.xlu2 %v211_v28, %s435_s10  ;;  %v5_v42 = vld [vmem:[%s736_s0] ss:$16 sm:%s4_s28]  }
  0x29   :  { %v7_v43 = vsel %vm6_vm0, %v5_v42, %v3_v41  ;;  %v9_v44 = vld [vmem:[%s736_s0] ss:$16 sm:%s8_s29]   ;;  %vm302_vm0 = vcmask 261312  }
  0x2a   :  { %v11_v45 = vsel %vm10_vm1, %v9_v44, %v7_v43  ;;  %v13_v46 = vld [vmem:[%s736_s0] ss:$16 sm:%s12_s30]   ;;  %vm324_vm1 = vcmask 195712  }
  0x2b   :  { %v15_v47 = vsel %vm14_vm2, %v13_v46, %v11_v45  ;;  %vm346_vm2 = vcmask 130112  }
  0x2c   :  { %17 = vst.msk [vmem:[%s737_s1] sm:$0xff] %vm16_vm3, %v15_v47  }
  0x30   :  { %278 = vrot.lane.b32.xlu2 %v277_v35, %s436_s23 }
  0x38   :  { %344 = vrot.lane.b32.xlu2 %v343_v40, %s437_s26 }
  0x72   :  { %v125_v48 = vpop.permute.xlu2 %124  }
  0x78   :  { %v37_v49 = vpop.permute.xlu0 %36  }
  0x79   :  { %39 = vst.msk [vmem:[%s737_s1] sm:$0xff] %vm38_vm4, %v37_v49  }
  0x7a   :  { %v81_v50 = vpop.permute.xlu1 %80   ;;  %v147_v51 = vpop.permute.xlu2 %146  }
  0x80   :  { %v59_v52 = vpop.permute.xlu0 %58  }
  0x81   :  { %61 = vst.msk [vmem:[%s737_s1] sm:$0xff] %vm60_vm5, %v59_v52  }
  0x82   :  { %83 = vst.msk [vmem:[%s737_s1] sm:$0xff] %vm82_vm6, %v81_v50   ;;  %v103_v53 = vpop.permute.xlu1 %102   ;;  %v213_v54 = vpop.permute.xlu2 %212  }
  0x83   :  { %105 = vst.msk [vmem:[%s737_s1] sm:$0xff] %vm104_vm7, %v103_v53  }
  0x84   :  { %127 = vst.msk [vmem:[%s737_s1] sm:$0xff] %vm126_vm8, %v125_v48  }
  0x85   :  { %149 = vst.msk [vmem:[%s737_s1] sm:$0xff] %vm148_vm9, %v147_v51  }
  0x88   :  { %v169_v55 = vpop.permute.xlu0 %168  }
  0x89   :  { %171 = vst.msk [vmem:[%s737_s1] sm:$0xff] %vm170_vm10, %v169_v55  }
  0x8a   :  { %v191_v56 = vpop.permute.xlu1 %190   ;;  %v279_v57 = vpop.permute.xlu2 %278  }
  0x8b   :  { %193 = vst.msk [vmem:[%s737_s1] sm:$0xff] %vm192_vm11, %v191_v56  }
  0x8c   :  { %215 = vst.msk [vmem:[%s737_s1] sm:$0xff] %vm214_vm12, %v213_v54  }
  0x90   :  { %v235_v58 = vpop.permute.xlu0 %234  }
  0x91   :  { %237 = vst.msk [vmem:[%s737_s1] sm:$0xff] %vm236_vm13, %v235_v58  }
  0x92   :  { %v257_v59 = vpop.permute.xlu1 %256   ;;  %v345_v60 = vpop.permute.xlu2 %344  }
  0x93   :  { %259 = vst.msk [vmem:[%s737_s1] sm:$0xff] %vm258_vm14, %v257_v59  }
  0x94   :  { %281 = vst.msk [vmem:[%s737_s1] sm:$0xff] %vm280_vm15, %v279_v57  }
  0x98   :  { %v301_v61 = vpop.permute.xlu0 %300  }
  0x99   :  { %303 = vst.msk [vmem:[%s737_s1] sm:$0xff] %vm302_vm0, %v301_v61  }
  0x9a   :  { %v323_v62 = vpop.permute.xlu1 %322  }
  0x9b   :  { %325 = vst.msk [vmem:[%s737_s1] sm:$0xff] %vm324_vm1, %v323_v62  }
  0x9c   :  { %347 = vst.msk [vmem:[%s737_s1] sm:$0xff] %vm346_vm2, %v345_v60  }

// kernel: double_conv.1
= control target key start
LH: loop header
LB: loop body
LE: loop exit
PB: predicated region body
PF: predicated region fallthrough
CT: control target
= control target key end

     0   :  { %vm33_vm0 = vcmask 523264   ;;  %vm36_vm1 = vcmask 517120   ;;  %v1176_v3 = vmov 0.0   ;;  %vm297_vm2 = vcmask 64512   ;;  %s1562_s1 = inlined_call_operand.vmem [shape: bf16[3,64,128], index: 1, kind: input, shape index: {}]   ;;  %s1563_s0 = inlined_call_operand.vmem [shape: bf16[2,16,64], index: 0, kind: input, shape index: {}]   ;;  %s1564_s7 = inlined_call_operand.vmem [shape: f32[128,8], index: 7, kind: input, shape index: {}]   ;;  %s1565_s8 = inlined_call_operand.vmem [shape: f32[8,128], index: 8, kind: input, shape index: {}]   ;;  %s1566_s4 = inlined_call_operand.vmem [shape: f32[1,8], index: 4, kind: input, shape index: {}]   ;;  %s1567_s2 = inlined_call_operand.vmem [shape: bf16[3,128,128], index: 2, kind: input, shape index: {}]   ;;  %s1568_s3 = inlined_call_operand.vmem [shape: f32[1,8], index: 3, kind: input, shape index: {}]   ;;  %s1569_s5 = inlined_call_operand.vmem [shape: f32[1,8], index: 5, kind: input, shape index: {}]   ;;  %s1570_s6 = inlined_call_operand.vmem [shape: f32[1,8], index: 6, kind: input, shape index: {}]   ;;  %s1571_s9 = inlined_call_operand.vmem [shape: f32[32,128], index: 9, kind: output, shape index: {}]  }
   0x1   :  { %v1133_v0 = vld [vmem:[%s1562_s1 + $0x38] sm:$0xff]  ;;  %34 = vst.msk [vmem:[#allocation2] sm:$0xff] %vm33_vm0, %v1176_v3  ;;  %v1132_v4 = vld [vmem:[%s1562_s1 + $0x30] sm:$0xff]  ;;  %v1163_v7 = vld [vmem:[%s1563_s0] sm:$0xff]  }
   0x2   :  { %v1129_v1 = vld [vmem:[%s1562_s1 + $0x18] sm:$0xff]  ;;  %35 = vst.msk [vmem:[#allocation2 + $0x8] sm:$0xff] %vm33_vm0, %v1176_v3  ;;  %116 = vmatpush.bf16.msra.mxu0 %v1133_v0  ;;  %v1128_v5 = vld [vmem:[%s1562_s1 + $0x10] sm:$0xff]  ;;  %v1164_v8 = vunpack.c.l.bf16 %v1163_v7  ;;  %v1165_v9 = vunpack.c.h.bf16 %v1163_v7  ;;  %v1131_v10 = vld [vmem:[%s1562_s1 + $0x28] sm:$0xff] }
   0x3   :  { %v1137_v2 = vld [vmem:[%s1562_s1 + $0x58] sm:$0xff]  ;;  %165 = vmatpush.bf16.msra.mxu1 %v1129_v1  ;;  %37 = vst.msk [vmem:[#allocation2 + $0x10] sm:$0x3] %vm36_vm1, %v1176_v3  ;;  %v1136_v6 = vld [vmem:[%s1562_s1 + $0x50] sm:$0xff]  ;;  %v1127_v11 = vld [vmem:[%s1562_s1 + $0x8] sm:$0xff] }
   0x4   :  { %229 = vmatpush.bf16.msra.mxu2 %v1137_v2  ;;  %38 = vst.msk [vmem:[#allocation2 + $0x18] sm:$0xff] %vm33_vm0, %v1176_v3  ;;  %v1135_v12 = vld [vmem:[%s1562_s1 + $0x48] sm:$0xff]  ;;  %v1130_v14 = vld [vmem:[%s1562_s1 + $0x20] sm:$0xff]  ;;  %v1288_v37 = vld [vmem:[%s1564_s7 + $0x78] sm:$0xff] }
   0x5   :  { %39 = vst.msk [vmem:[#allocation2 + $0x20] sm:$0xff] %vm33_vm0, %v1176_v3  ;;  %v1170_v13 = vld [vmem:[%s1563_s0 + $0x8] sm:$0xff]   ;;  %v1126_v15 = vld [vmem:[%s1562_s1] sm:$0xff]  ;;  %275 = vmatpush.msra.mxu3 %v1288_v37  ;;  %v1295_v38 = vld [vmem:[%s1564_s7 + $0x70] sm:$0xff] }
   0x6   :  { %40 = vst.msk [vmem:[#allocation2 + $0x28] sm:$0x3] %vm36_vm1, %v1176_v3  ;;  %117 = vmatpush.bf16.msra.mxu0 %v1132_v4  ;;  %v1168_v16 = vunpack.c.l.bf16 %v1170_v13  ;;  %v1134_v17 = vld [vmem:[%s1562_s1 + $0x40] sm:$0xff]  ;;  %v1169_v18 = vunpack.c.h.bf16 %v1170_v13  ;;  %v1300_v39 = vld [vmem:[%s1564_s7 + $0x68] sm:$0xff]  ;;  %v1316_v41 = vld [vmem:[%s1564_s7 + $0x58] sm:$0xff] }
   0x7   :  { %166 = vmatpush.bf16.msra.mxu1 %v1128_v5  ;;  %440 = vst [vmem:[#allocation3] sm:$0xff] %v1176_v3  ;;  %276 = vmatpush.msra.mxu3 %v1295_v38  ;;  %v1309_v40 = vld [vmem:[%s1564_s7 + $0x60] sm:$0xff]  ;;  %v1323_v42 = vld [vmem:[%s1564_s7 + $0x50] sm:$0xff]  ;;  %v1328_v43 = vld [vmem:[%s1564_s7 + $0x48] sm:$0xff] }
   0x8   :  { %230 = vmatpush.bf16.msra.mxu2 %v1136_v6  ;;  %49 = vst.msk [vmem:[#allocation2 + $0x1] sm:$0xff] %vm33_vm0, %v1164_v8  ;;  %v1337_v44 = vld [vmem:[%s1564_s7 + $0x40] sm:$0xff]  ;;  %v1344_v47 = vld [vmem:[%s1564_s7 + $0x38] sm:$0xff]  ;;  %v1351_v48 = vld [vmem:[%s1564_s7 + $0x30] sm:$0xff] }
   0x9   :  { %50 = vst.msk [vmem:[#allocation2 + $0x9] sm:$0xff] %vm33_vm0, %v1165_v9  ;;  %277 = vmatpush.msra.mxu3 %v1300_v39  ;;  %v1358_v49 = vld [vmem:[%s1564_s7 + $0x28] sm:$0xff]  ;;  %v1365_v50 = vld [vmem:[%s1564_s7 + $0x20] sm:$0xff]  ;;  %v1370_v51 = vld [vmem:[%s1564_s7 + $0x18] sm:$0xff] }
   0xa   :  { %441 = vst [vmem:[#allocation3 + $0x8] sm:$0xff] %v1176_v3  ;;  %118 = vmatpush.bf16.msra.mxu0 %v1131_v10  ;;  %v1377_v55 = vld [vmem:[%s1564_s7 + $0x10] sm:$0xff]  ;;  %v1384_v56 = vld [vmem:[%s1564_s7 + $0x8] sm:$0xff]  ;;  %v1391_v57 = vld [vmem:[%s1564_s7] sm:$0xff] }
   0xb   :  { %167 = vmatpush.bf16.msra.mxu1 %v1127_v11  ;;  %442 = vst [vmem:[#allocation3 + $0x10] sm:$0x3] %v1176_v3  ;;  %278 = vmatpush.msra.mxu3 %v1309_v40  ;;  %v1400_v59 = vld [vmem:[%s1565_s8] sm:$0xff] }
   0xc   :  { %231 = vmatpush.bf16.msra.mxu2 %v1135_v12  ;;  %443 = vst [vmem:[#allocation3 + $0x18] sm:$0xff] %v1176_v3 }
   0xd   :  { %444 = vst [vmem:[#allocation3 + $0x20] sm:$0xff] %v1176_v3  ;;  %279 = vmatpush.msra.mxu3 %v1316_v41 }
   0xe   :  { %445 = vst [vmem:[#allocation3 + $0x28] sm:$0x3] %v1176_v3  ;;  %119 = vmatpush.bf16.msra.mxu0 %v1130_v14 }
   0xf   :  { %168 = vmatpush.bf16.msra.mxu1 %v1126_v15  ;;  %v67_v19 = vld [vmem:[#allocation2 + $0x1] sm:$0xff]  ;;  %51 = vst.msk [vmem:[#allocation2 + $0x19] sm:$0xff] %vm33_vm0, %v1168_v16  ;;  %280 = vmatpush.msra.mxu3 %v1323_v42 }
  0x10   :  { %v53_v20 = vld [vmem:[#allocation2] sm:$0xff]  ;;  %232 = vmatpush.bf16.msra.mxu2 %v1134_v17  ;;  %v68_v21 = vld [vmem:[#allocation2 + $0x9] sm:$0xff]  ;;  %52 = vst.msk [vmem:[#allocation2 + $0x21] sm:$0xff] %vm33_vm0, %v1169_v18 }
  0x11   :  { %v54_v22 = vld [vmem:[#allocation2 + $0x8] sm:$0xff]  ;;  %v71_v24 = vpack.c.bf16 %v68_v21, %v67_v19  ;;  %281 = vmatpush.msra.mxu3 %v1328_v43 }
  0x12   :  { %v180_v23 = vld [vmem:[#allocation2 + $0x2] sm:$0xff]  ;;  %v57_v25 = vpack.c.bf16 %v54_v22, %v53_v20  ;;  %v181_v26 = vld [vmem:[#allocation2 + $0xa] sm:$0xff]  ;;  %339 = vmatpush.msrb.mxu0 %v1288_v37 }
  0x13   :  { %v184_v27 = vpack.c.bf16 %v181_v26, %v180_v23  ;;  %946 = vmatmul.msk.bf16.vlgmr.msra.gmra.mxu0 %vm33_vm0, %v71_v24  ;;  %282 = vmatpush.msra.mxu3 %v1337_v44 }
  0x14   :  { %964 = vmatmul.msk.bf16.vlgmr.msra.gmra.mxu1 %vm33_vm0, %v57_v25  ;;  %340 = vmatpush.msrb.mxu0 %v1295_v38 }
  0x15   :  { %990 = vmatmul.msk.bf16.vlgmr.msra.gmra.mxu2 %vm33_vm0, %v184_v27  ;;  %283 = vmatpush.msra.mxu3 %v1344_v47 }
  0x16   :  { %v69_v28 = vld [vmem:[#allocation2 + $0x19] sm:$0xff]  ;;  %341 = vmatpush.msrb.mxu0 %v1300_v39  ;;  %413 = vmatpush.msrb.mxu2 %v1400_v59 }
  0x17   :  { %v70_v29 = vld [vmem:[#allocation2 + $0x21] sm:$0xff]  ;;  %v55_v30 = vld [vmem:[#allocation2 + $0x18] sm:$0xff]  ;;  %284 = vmatpush.msra.mxu3 %v1351_v48  ;;  %390 = vmatpush.msrb.mxu1 %v1400_v59 }
  0x18   :  { %v56_v31 = vld [vmem:[#allocation2 + $0x20] sm:$0xff]  ;;  %v72_v34 = vpack.c.bf16 %v70_v29, %v69_v28  ;;  %342 = vmatpush.msrb.mxu0 %v1309_v40  ;;  %750 = vmatpush.msra.mxu2 %v1288_v37 }
  0x19   :  { %v182_v32 = vld [vmem:[#allocation2 + $0x1a] sm:$0xff]  ;;  %v183_v33 = vld [vmem:[#allocation2 + $0x22] sm:$0xff]  ;;  %v58_v35 = vpack.c.bf16 %v56_v31, %v55_v30  ;;  %285 = vmatpush.msra.mxu3 %v1358_v49 }
  0x1a   :  { %v185_v36 = vpack.c.bf16 %v183_v33, %v182_v32  ;;  %343 = vmatpush.msrb.mxu0 %v1316_v41  ;;  %751 = vmatpush.msra.mxu2 %v1295_v38 }
  0x1b   :  { %286 = vmatpush.msra.mxu3 %v1365_v50 }
  0x1c   :  { %344 = vmatpush.msrb.mxu0 %v1323_v42  ;;  %752 = vmatpush.msra.mxu2 %v1300_v39 }
  0x1d   :  { %287 = vmatpush.msra.mxu3 %v1370_v51 }
  0x1e   :  { %345 = vmatpush.msrb.mxu0 %v1328_v43  ;;  %753 = vmatpush.msra.mxu2 %v1309_v40 }
  0x1f   :  { %288 = vmatpush.msra.mxu3 %v1377_v55 }
  0x20   :  { %346 = vmatpush.msrb.mxu0 %v1337_v44  ;;  %754 = vmatpush.msra.mxu2 %v1316_v41 }
  0x21   :  { %289 = vmatpush.msra.mxu3 %v1384_v56 }
  0x22   :  { %347 = vmatpush.msrb.mxu0 %v1344_v47  ;;  %755 = vmatpush.msra.mxu2 %v1323_v42 }
  0x23   :  { %947 = vmatmul.msk.bf16.gmra.mxu0 %vm33_vm0, %v72_v34  ;;  %290 = vmatpush.msra.mxu3 %v1391_v57 }
  0x24   :  { %965 = vmatmul.msk.bf16.gmra.mxu1 %vm33_vm0, %v58_v35  ;;  %348 = vmatpush.msrb.mxu0 %v1351_v48 }
  0x25   :  { %991 = vmatmul.msk.bf16.gmra.mxu2 %vm33_vm0, %v185_v36  ;;  %316 = vmatpush.msrb.mxu3 %v1400_v59 }
  0x26   :  { %349 = vmatpush.msrb.mxu0 %v1358_v49  ;;  %756 = vmatpush.msra.mxu2 %v1328_v43 }
  0x28   :  { %350 = vmatpush.msrb.mxu0 %v1365_v50  ;;  %757 = vmatpush.msra.mxu2 %v1337_v44 }
  0x2a   :  { %351 = vmatpush.msrb.mxu0 %v1370_v51  ;;  %758 = vmatpush.msra.mxu2 %v1344_v47 }
  0x2c   :  { %352 = vmatpush.msrb.mxu0 %v1377_v55  ;;  %759 = vmatpush.msra.mxu2 %v1351_v48 }
  0x2e   :  { %353 = vmatpush.msrb.mxu0 %v1384_v56  ;;  %760 = vmatpush.msra.mxu2 %v1358_v49 }
  0x30   :  { %354 = vmatpush.msrb.mxu0 %v1391_v57  ;;  %761 = vmatpush.msra.mxu2 %v1365_v50 }
  0x32   :  { %762 = vmatpush.msra.mxu2 %v1370_v51 }
  0x34   :  { %763 = vmatpush.msra.mxu2 %v1377_v55 }
  0x36   :  { %764 = vmatpush.msra.mxu2 %v1384_v56 }
  0x38   :  { %765 = vmatpush.msra.mxu2 %v1391_v57 }
  0x90   :  { %v121_v45 = vpop.f32.mrf.mxu0 }
  0x91   :  { %v170_v46 = vpop.f32.mrf.mxu1 }
  0x92   :  { %v171_v63 = vadd.f32 %v170_v46, %v121_v45 }
  0x98   :  { %v234_v52 = vpop.f32.mrf.mxu2  ;;  %v123_v53 = vpop.f32.mrf.mxu0 }
  0x99   :  { %v172_v54 = vpop.f32.mrf.mxu1  ;;  %v244_v5 = vadd.f32 %v234_v52, %v171_v63  ;;  %v1160_v63 = vld [vmem:[%s1567_s2 + $0xb0] sm:$0xff] }
  0x9a   :  { %v173_v0 = vadd.f32 %v172_v54, %v123_v53  ;;  %v249_v53 = vld [vmem:[%s1566_s4] sm:$0x1]  ;;  %v1153_v54 = vld [vmem:[%s1567_s2 + $0x78] sm:$0xff] }
  0x9b   :  { %994 = vmatmul.msk.f32.vlgmr.msrb.gmra.mxu2 %vm297_vm2, %v249_v53 }
  0x9c   :  { %790 = vmatpush.msrb.mxu2 %v1400_v59 }
  0xa0   :  { %v236_v58 = vpop.f32.mrf.mxu2  ;;  %v126_v60 = vpop.f32.mrf.mxu0 }
  0xa1   :  { %v175_v61 = vpop.f32.mrf.mxu1  ;;  %v245_v2 = vadd.f32 %v236_v58, %v173_v0  ;;  %v1145_v58 = vld [vmem:[%s1567_s2 + $0x38] sm:$0xff]  ;;  %v1151_v0 = vld [vmem:[%s1567_s2 + $0x68] sm:$0xff] }
  0xa2   :  { %v176_v1 = vadd.f32 %v175_v61, %v126_v60  ;;  %v1161_v60 = vld [vmem:[%s1567_s2 + $0xb8] sm:$0xff]  ;;  %610 = vmatpush.bf16.msra.mxu0 %v1145_v58  ;;  %v1152_v61 = vld [vmem:[%s1567_s2 + $0x70] sm:$0xff] }
  0xa3   :  { %v250_v7 = vadd.f32 %v245_v2, %v244_v5  ;;  %700 = vmatpush.bf16.msra.mxu1 %v1161_v60 }
  0xa7   :  { %701 = vmatpush.bf16.msra.mxu1 %v1160_v63 }
  0xa8   :  { %v239_v62 = vpop.f32.mrf.mxu2  ;;  %v128_v3 = vpop.f32.mrf.mxu0 }
  0xa9   :  { %v177_v4 = vpop.f32.mrf.mxu1  ;;  %v246_v6 = vadd.f32 %v239_v62, %v176_v1  ;;  %v1144_v62 = vld [vmem:[%s1567_s2 + $0x30] sm:$0xff]  ;;  %v1143_v1 = vld [vmem:[%s1567_s2 + $0x28] sm:$0xff] }
  0xaa   :  { %v178_v8 = vadd.f32 %v177_v4, %v128_v3  ;;  %611 = vmatpush.bf16.msra.mxu0 %v1144_v62  ;;  %v1159_v3 = vld [vmem:[%s1567_s2 + $0xa8] sm:$0xff] }
  0xab   :  { %v251_v10 = vadd.f32 %v250_v7, %v246_v6  ;;  %702 = vmatpush.bf16.msra.mxu1 %v1159_v3 }
  0xae   :  { %612 = vmatpush.bf16.msra.mxu0 %v1143_v1 }
  0xb0   :  { %v241_v9 = vpop.f32.mrf.mxu2 }
  0xb1   :  { %v247_v11 = vadd.f32 %v241_v9, %v178_v8 }
  0xb3   :  { %v252_v12 = vadd.f32 %v251_v10, %v247_v11 }
  0xb5   :  { %v253_v13 = vrot.slane %v252_v12, 4 }
  0xb7   :  { %v254_v14 = vadd.f32 %v253_v13, %v252_v12  ;;  %v248_v12 = vld [vmem:[%s1568_s3] sm:$0x1] }
  0xb9   :  { %v255_v15 = vrot.slane %v254_v14, 2 }
  0xbb   :  { %v256_v16 = vadd.f32 %v255_v15, %v254_v14  ;;  %v1150_v15 = vld [vmem:[%s1567_s2 + $0x60] sm:$0xff] }
  0xbd   :  { %v257_v17 = vrot.slane %v256_v16, 1 }
  0xbf   :  { %v258_v18 = vadd.f32 %v257_v17, %v256_v16  ;;  %v1142_v16 = vld [vmem:[%s1567_s2 + $0x20] sm:$0xff] }
  0xc0   :  { %v1158_v17 = vld [vmem:[%s1567_s2 + $0xa0] sm:$0xff]  ;;  %613 = vmatpush.bf16.msra.mxu0 %v1142_v16 }
  0xc1   :  { %291 = vmatmul.f32.vlgmr.msra.gmra.mxu3 %v258_v18  ;;  %v1149_v18 = vld [vmem:[%s1567_s2 + $0x58] sm:$0xff]  ;;  %703 = vmatpush.bf16.msra.mxu1 %v1158_v17 }
  0xc2   :  { %543 = vmatpush.bf16.msra.mxu3 %v1153_v54 }
  0xc6   :  { %544 = vmatpush.bf16.msra.mxu3 %v1152_v61 }
  0xca   :  { %545 = vmatpush.bf16.msra.mxu3 %v1151_v0 }
  0xce   :  { %546 = vmatpush.bf16.msra.mxu3 %v1150_v15 }
  0xd2   :  { %547 = vmatpush.bf16.msra.mxu3 %v1149_v18 }
 0x144   :  { %v292_v19 = vpop.f32.mrf.mxu3 }
 0x145   :  { %v295_v20 = vmul.f32 0.001953125, %v292_v19  ;;  %v1148_v19 = vld [vmem:[%s1567_s2 + $0x50] sm:$0xff] }
 0x146   :  { %548 = vmatpush.bf16.msra.mxu3 %v1148_v19 }
 0x147   :  { %992 = vmatmul.msk.f32.vlgmr.msrb.gmra.mxu3 %vm297_vm2, %v295_v20  ;;  %v1141_v20 = vld [vmem:[%s1567_s2 + $0x18] sm:$0xff] }
 0x148   :  { %614 = vmatpush.bf16.msra.mxu0 %v1141_v20 }
 0x1ca   :  { %v318_v21 = vpop.f32.mrf.mxu3 }
 0x1cb   :  { %v321_v22 = vperm.slane %v318_v21, 0  ;;  %v1157_v21 = vld [vmem:[%s1567_s2 + $0x98] sm:$0xff] }
 0x1cc   :  { %704 = vmatpush.bf16.msra.mxu1 %v1157_v21 }
 0x1cd   :  { %v1422_v23 = vsub.f32 %v244_v5, %v321_v22  ;;  %v1424_v24 = vsub.f32 %v245_v2, %v321_v22  ;;  %v1426_v25 = vsub.f32 %v246_v6, %v321_v22  ;;  %v1428_v26 = vsub.f32 %v247_v11, %v321_v22  ;;  %v1147_v22 = vld [vmem:[%s1567_s2 + $0x48] sm:$0xff] }
 0x1ce   :  { %549 = vmatpush.bf16.msra.mxu3 %v1147_v22 }
 0x1cf   :  { %v326_v27 = vmul.f32 %v1422_v23, %v1422_v23  ;;  %v327_v28 = vmul.f32 %v1424_v24, %v1424_v24  ;;  %v328_v29 = vmul.f32 %v1426_v25, %v1426_v25  ;;  %v329_v31 = vmul.f32 %v1428_v26, %v1428_v26 }
 0x1d1   :  { %v330_v30 = vadd.f32 %v327_v28, %v326_v27  ;;  %v1140_v27 = vld [vmem:[%s1567_s2 + $0x10] sm:$0xff] }
 0x1d2   :  { %v1156_v28 = vld [vmem:[%s1567_s2 + $0x90] sm:$0xff]  ;;  %615 = vmatpush.bf16.msra.mxu0 %v1140_v27 }
 0x1d3   :  { %v331_v32 = vadd.f32 %v330_v30, %v328_v29  ;;  %v1146_v29 = vld [vmem:[%s1567_s2 + $0x40] sm:$0xff]  ;;  %705 = vmatpush.bf16.msra.mxu1 %v1156_v28  ;;  %v1139_v30 = vld [vmem:[%s1567_s2 + $0x8] sm:$0xff] }
 0x1d4   :  { %550 = vmatpush.bf16.msra.mxu3 %v1146_v29 }
 0x1d5   :  { %v332_v33 = vadd.f32 %v331_v32, %v329_v31  ;;  %v1155_v31 = vld [vmem:[%s1567_s2 + $0x88] sm:$0xff]  ;;  %v1138_v32 = vld [vmem:[%s1567_s2] sm:$0xff] }
 0x1d6   :  { %616 = vmatpush.bf16.msra.mxu0 %v1139_v30 }
 0x1d7   :  { %v333_v34 = vrot.slane %v332_v33, 4  ;;  %706 = vmatpush.bf16.msra.mxu1 %v1155_v31 }
 0x1d8   :  { %813 = vmatpush.msrb.mxu3 %v1288_v37  ;;  %v415_v37 = vpop.f32.mrf.mxu2 }
 0x1d9   :  { %v334_v35 = vadd.f32 %v333_v34, %v332_v33  ;;  %v1154_v33 = vld [vmem:[%s1567_s2 + $0x80] sm:$0xff] }
 0x1da   :  { %814 = vmatpush.msrb.mxu3 %v1295_v38  ;;  %617 = vmatpush.bf16.msra.mxu0 %v1138_v32  ;;  %v423_v38 = vperm.slane %v415_v37, 0 }
 0x1db   :  { %v335_v36 = vrot.slane %v334_v35, 2  ;;  %707 = vmatpush.bf16.msra.mxu1 %v1154_v33 }
 0x1dc   :  { %815 = vmatpush.msrb.mxu3 %v1300_v39 }
 0x1dd   :  { %v336_v45 = vadd.f32 %v335_v36, %v334_v35 }
 0x1de   :  { %816 = vmatpush.msrb.mxu3 %v1309_v40 }
 0x1df   :  { %v337_v46 = vrot.slane %v336_v45, 1 }
 0x1e0   :  { %817 = vmatpush.msrb.mxu3 %v1316_v41 }
 0x1e1   :  { %v338_v52 = vadd.f32 %v337_v46, %v336_v45 }
 0x1e2   :  { %818 = vmatpush.msrb.mxu3 %v1323_v42 }
 0x1e3   :  { %355 = vmatmul.f32.vlgmr.msrb.gmra.mxu0 %v338_v52 }
 0x1e4   :  { %819 = vmatpush.msrb.mxu3 %v1328_v43 }
 0x1e6   :  { %820 = vmatpush.msrb.mxu3 %v1337_v44 }
 0x1e8   :  { %821 = vmatpush.msrb.mxu3 %v1344_v47 }
 0x1ea   :  { %822 = vmatpush.msrb.mxu3 %v1351_v48 }
 0x1ec   :  { %823 = vmatpush.msrb.mxu3 %v1358_v49 }
 0x1ee   :  { %824 = vmatpush.msrb.mxu3 %v1365_v50 }
 0x1f0   :  { %825 = vmatpush.msrb.mxu3 %v1370_v51 }
 0x1f2   :  { %826 = vmatpush.msrb.mxu3 %v1377_v55 }
 0x1f4   :  { %827 = vmatpush.msrb.mxu3 %v1384_v56 }
 0x1f6   :  { %828 = vmatpush.msrb.mxu3 %v1391_v57 }
 0x260   :  { %v356_v2 = vpop.f32.mrf.mxu0 }
 0x261   :  { %v359_v4 = vmul.f32 0.001953125, %v356_v2 }
 0x263   :  { %v360_v5 = vadd.f32 1e-05, %v359_v4 }
 0x265   :  { %1172 = vrsqrt.f32 %v360_v5  ;;  %vm367_vm4 = vweird.f32 %v360_v5 }
 0x26b   :  { %v1173_v6 = vpop.eup %1172 }
 0x26c   :  { %v362_v7 = vmul.f32 %v1173_v6, %v360_v5  ;;  %vm368_vm3 = vweird.f32 %v1173_v6 }
 0x26d   :  { %vm369_vm5 = vmor %vm367_vm4, %vm368_vm3 }
 0x26e   :  { %v363_v8 = vmul.f32 %v1173_v6, %v362_v7 }
 0x270   :  { %v364_v9 = vmul.f32 0.5, %v363_v8 }
 0x272   :  { %v365_v10 = vsub.f32 1.5, %v364_v9 }
 0x274   :  { %v366_v11 = vmul.f32 %v1173_v6, %v365_v10 }
 0x276   :  { %v370_v13 = vsel %vm369_vm5, %v1173_v6, %v366_v11 }
 0x277   :  { %v371_v14 = vmul.f32 %v370_v13, %v248_v12 }
 0x279   :  { %993 = vmatmul.msk.f32.vlgmr.msrb.gmra.mxu1 %vm297_vm2, %v371_v14 }
 0x2f6   :  { %v392_v34 = vpop.f32.mrf.mxu1 }
 0x2f7   :  { %v418_v35 = vperm.slane %v392_v34, 0 }
 0x2f9   :  { %v419_v39 = vmul.f32 %v418_v35, %v1422_v23  ;;  %v420_v40 = vmul.f32 %v418_v35, %v1424_v24  ;;  %v421_v41 = vmul.f32 %v418_v35, %v1426_v25  ;;  %v422_v42 = vmul.f32 %v418_v35, %v1428_v26 }
 0x2fb   :  { %v424_v43 = vadd.f32 %v423_v38, %v419_v39  ;;  %v425_v36 = vadd.f32 %v423_v38, %v420_v40  ;;  %v426_v44 = vadd.f32 %v423_v38, %v421_v41  ;;  %v427_v45 = vadd.f32 %v423_v38, %v422_v42 }
 0x2fd   :  { %vm428_vm6 = vcmp.ge.f32.partialorder %v424_v43, 0.0  ;;  %vm429_vm7 = vcmp.ge.f32.partialorder %v425_v36, 0.0  ;;  %vm430_vm8 = vcmp.ge.f32.partialorder %v426_v44, 0.0  ;;  %vm431_vm9 = vcmp.ge.f32.partialorder %v427_v45, 0.0 }
 0x2fe   :  { %v432_v47 = vmul.f32 0.01, %v424_v43  ;;  %v433_v48 = vmul.f32 0.01, %v425_v36  ;;  %v434_v23 = vmul.f32 0.01, %v426_v44 }
 0x2ff   :  { %v435_v24 = vmul.f32 0.01, %v427_v45 }
 0x300   :  { %v436_v25 = vsel %vm428_vm6, %v424_v43, %v432_v47  ;;  %v437_v26 = vsel %vm429_vm7, %v425_v36, %v433_v48  ;;  %v438_v46 = vsel %vm430_vm8, %v426_v44, %v434_v23 }
 0x301   :  { %v439_v49 = vsel %vm431_vm9, %v427_v45, %v435_v24  ;;  %446 = vst [vmem:[#allocation3 + $0x1] sm:$0xff] %v436_v25  ;;  %v476_v52 = vpack.c.bf16 %v437_v26, %v436_v25 }
 0x302   :  { %447 = vst [vmem:[#allocation3 + $0x9] sm:$0xff] %v437_v26  ;;  %v477_v55 = vpack.c.bf16 %v439_v49, %v438_v46 }
 0x303   :  { %448 = vst [vmem:[#allocation3 + $0x19] sm:$0xff] %v438_v46  ;;  %551 = vmatmul.bf16.vlgmr.msra.gmra.mxu3 %v476_v52 }
 0x304   :  { %449 = vst [vmem:[#allocation3 + $0x21] sm:$0xff] %v439_v49 }
 0x308   :  { %v450_v50 = vld [vmem:[#allocation3] sm:$0xff] }
 0x309   :  { %v451_v53 = vld [vmem:[#allocation3 + $0x8] sm:$0xff] }
 0x30a   :  { %v629_v51 = vld [vmem:[#allocation3 + $0x2] sm:$0xff]  ;;  %v630_v54 = vld [vmem:[#allocation3 + $0xa] sm:$0xff]  ;;  %v454_v58 = vpack.c.bf16 %v451_v53, %v450_v50  ;;  %v452_v61 = vld [vmem:[#allocation3 + $0x18] sm:$0xff] }
 0x30b   :  { %v633_v60 = vpack.c.bf16 %v630_v54, %v629_v51  ;;  %v453_v62 = vld [vmem:[#allocation3 + $0x20] sm:$0xff] }
 0x30c   :  { %618 = vmatmul.bf16.vlgmr.msra.gmra.mxu0 %v454_v58  ;;  %v631_v63 = vld [vmem:[#allocation3 + $0x1a] sm:$0xff]  ;;  %v632_v0 = vld [vmem:[#allocation3 + $0x22] sm:$0xff]  ;;  %v455_v56 = vpack.c.bf16 %v453_v62, %v452_v61  ;;  %v723_v61 = vld [vmem:[%s1569_s5] sm:$0x1] }
 0x30d   :  { %708 = vmatmul.bf16.vlgmr.msra.gmra.mxu1 %v633_v60  ;;  %v634_v1 = vpack.c.bf16 %v632_v0, %v631_v63 }
 0x313   :  { %556 = vmatmul.bf16.gmra.mxu3 %v477_v55 }
 0x31c   :  { %623 = vmatmul.bf16.gmra.mxu0 %v455_v56  ;;  %v724_v56 = vld [vmem:[%s1570_s6] sm:$0x1] }
 0x31d   :  { %713 = vmatmul.bf16.gmra.mxu1 %v634_v1 }
 0x386   :  { %v552_v2 = vpop.f32.mrf.mxu3 }
 0x389   :  { %v619_v57 = vpop.f32.mrf.mxu0 }
 0x38a   :  { %v709_v3 = vpop.f32.mrf.mxu1  ;;  %v620_v11 = vadd.f32 %v619_v57, %v552_v2 }
 0x38c   :  { %v719_v14 = vadd.f32 %v709_v3, %v620_v11 }
 0x38e   :  { %v554_v4 = vpop.f32.mrf.mxu3 }
 0x391   :  { %v621_v5 = vpop.f32.mrf.mxu0 }
 0x392   :  { %v711_v6 = vpop.f32.mrf.mxu1  ;;  %v622_v10 = vadd.f32 %v621_v5, %v554_v4 }
 0x394   :  { %v720_v13 = vadd.f32 %v711_v6, %v622_v10 }
 0x396   :  { %v557_v7 = vpop.f32.mrf.mxu3  ;;  %v725_v18 = vadd.f32 %v720_v13, %v719_v14 }
 0x399   :  { %v624_v8 = vpop.f32.mrf.mxu0 }
 0x39a   :  { %v714_v9 = vpop.f32.mrf.mxu1  ;;  %v625_v12 = vadd.f32 %v624_v8, %v557_v7 }
 0x39c   :  { %v721_v15 = vadd.f32 %v714_v9, %v625_v12 }
 0x39e   :  { %v559_v17 = vpop.f32.mrf.mxu3  ;;  %v726_v21 = vadd.f32 %v725_v18, %v721_v15 }
 0x3a1   :  { %v626_v16 = vpop.f32.mrf.mxu0 }
 0x3a2   :  { %v627_v19 = vadd.f32 %v626_v16, %v559_v17  ;;  %v716_v20 = vpop.f32.mrf.mxu1 }
 0x3a4   :  { %v722_v22 = vadd.f32 %v716_v20, %v627_v19 }
 0x3a6   :  { %v727_v27 = vadd.f32 %v726_v21, %v722_v22 }
 0x3a8   :  { %v728_v28 = vrot.slane %v727_v27, 4 }
 0x3aa   :  { %v729_v29 = vadd.f32 %v728_v28, %v727_v27 }
 0x3ac   :  { %v730_v30 = vrot.slane %v729_v29, 2 }
 0x3ae   :  { %v731_v31 = vadd.f32 %v730_v30, %v729_v29 }
 0x3b0   :  { %v732_v32 = vrot.slane %v731_v31, 1 }
 0x3b2   :  { %v733_v33 = vadd.f32 %v732_v32, %v731_v31 }
 0x3b4   :  { %766 = vmatmul.f32.vlgmr.msra.gmra.mxu2 %v733_v33 }
 0x3b5   :  { %864 = vmatpush.msra.mxu2 %v1400_v59 }
 0x437   :  { %v767_v37 = vpop.f32.mrf.mxu2 }
 0x438   :  { %v770_v34 = vmul.f32 0.001953125, %v767_v37 }
 0x43a   :  { %1123 = vmatmul.msk.f32.vlgmr.msrb.gmra.mxu2 %vm297_vm2, %v770_v34 }
 0x43b   :  { %887 = vmatpush.msrb.mxu2 %v1400_v59 }
 0x4bd   :  { %v792_v35 = vpop.f32.mrf.mxu2 }
 0x4be   :  { %v795_v38 = vperm.slane %v792_v35, 0 }
 0x4c0   :  { %v796_v39 = vsub.f32 %v719_v14, %v795_v38  ;;  %v797_v40 = vsub.f32 %v720_v13, %v795_v38  ;;  %v798_v41 = vsub.f32 %v721_v15, %v795_v38  ;;  %v799_v42 = vsub.f32 %v722_v22, %v795_v38 }
 0x4c2   :  { %v800_v43 = vmul.f32 %v796_v39, %v796_v39  ;;  %v801_v36 = vmul.f32 %v797_v40, %v797_v40  ;;  %v802_v44 = vmul.f32 %v798_v41, %v798_v41  ;;  %v803_v47 = vmul.f32 %v799_v42, %v799_v42 }
 0x4c4   :  { %v804_v45 = vadd.f32 %v801_v36, %v800_v43 }
 0x4c6   :  { %v805_v48 = vadd.f32 %v804_v45, %v802_v44 }
 0x4c8   :  { %v806_v23 = vadd.f32 %v805_v48, %v803_v47 }
 0x4ca   :  { %v807_v24 = vrot.slane %v806_v23, 4 }
 0x4cc   :  { %v808_v25 = vadd.f32 %v807_v24, %v806_v23 }
 0x4ce   :  { %v809_v26 = vrot.slane %v808_v25, 2 }
 0x4d0   :  { %v810_v46 = vadd.f32 %v809_v26, %v808_v25 }
 0x4d2   :  { %v811_v49 = vrot.slane %v810_v46, 1 }
 0x4d4   :  { %v812_v52 = vadd.f32 %v811_v49, %v810_v46 }
 0x4d6   :  { %829 = vmatmul.f32.vlgmr.msrb.gmra.mxu3 %v812_v52 }
 0x559   :  { %v830_v59 = vpop.f32.mrf.mxu3 }
 0x55a   :  { %v833_v50 = vmul.f32 0.001953125, %v830_v59 }
 0x55c   :  { %v834_v53 = vadd.f32 1e-05, %v833_v50 }
 0x55e   :  { %1174 = vrsqrt.f32 %v834_v53  ;;  %vm841_vm11 = vweird.f32 %v834_v53 }
 0x564   :  { %v1175_v51 = vpop.eup %1174 }
 0x565   :  { %v836_v54 = vmul.f32 %v1175_v51, %v834_v53  ;;  %vm842_vm10 = vweird.f32 %v1175_v51 }
 0x566   :  { %vm843_vm12 = vmor %vm841_vm11, %vm842_vm10 }
 0x567   :  { %v837_v58 = vmul.f32 %v1175_v51, %v836_v54 }
 0x569   :  { %v838_v60 = vmul.f32 0.5, %v837_v58 }
 0x56b   :  { %v839_v55 = vsub.f32 1.5, %v838_v60 }
 0x56d   :  { %v840_v62 = vmul.f32 %v1175_v51, %v839_v55 }
 0x56f   :  { %v844_v63 = vsel %vm843_vm12, %v1175_v51, %v840_v62 }
 0x570   :  { %v845_v0 = vmul.f32 %v844_v63, %v723_v61 }
 0x572   :  { %1124 = vmatmul.msk.f32.vlgmr.msra.gmra.mxu2 %vm297_vm2, %v845_v0 }
 0x57a   :  { %1125 = vmatmul.msk.f32.vlgmr.msrb.gmra.mxu2 %vm297_vm2, %v724_v56 }
 0x5f5   :  { %v866_v1 = vpop.f32.mrf.mxu2 }
 0x5f6   :  { %v892_v2 = vperm.slane %v866_v1, 0 }
 0x5f8   :  { %v893_v57 = vmul.f32 %v892_v2, %v796_v39  ;;  %v894_v4 = vmul.f32 %v892_v2, %v797_v40  ;;  %v895_v5 = vmul.f32 %v892_v2, %v798_v41  ;;  %v896_v6 = vmul.f32 %v892_v2, %v799_v42 }
 0x5fd   :  { %v889_v3 = vpop.f32.mrf.mxu2 }
 0x5fe   :  { %v897_v7 = vperm.slane %v889_v3, 0 }
 0x600   :  { %v898_v8 = vadd.f32 %v897_v7, %v893_v57  ;;  %v899_v9 = vadd.f32 %v897_v7, %v894_v4  ;;  %v900_v10 = vadd.f32 %v897_v7, %v895_v5  ;;  %v901_v11 = vadd.f32 %v897_v7, %v896_v6 }
 0x602   :  { %vm902_vm13 = vcmp.ge.f32.partialorder %v898_v8, 0.0  ;;  %vm903_vm14 = vcmp.ge.f32.partialorder %v899_v9, 0.0  ;;  %vm904_vm15 = vcmp.ge.f32.partialorder %v900_v10, 0.0  ;;  %vm905_vm0 = vcmp.ge.f32.partialorder %v901_v11, 0.0 }
 0x603   :  { %v906_v12 = vmul.f32 0.01, %v898_v8  ;;  %v907_v13 = vmul.f32 0.01, %v899_v9  ;;  %v908_v14 = vmul.f32 0.01, %v900_v10 }
 0x604   :  { %v909_v15 = vmul.f32 0.01, %v901_v11 }
 0x605   :  { %v910_v16 = vsel %vm902_vm13, %v898_v8, %v906_v12  ;;  %v911_v17 = vsel %vm903_vm14, %v899_v9, %v907_v13  ;;  %v912_v18 = vsel %vm904_vm15, %v900_v10, %v908_v14 }
 0x606   :  { %v913_v19 = vsel %vm905_vm0, %v901_v11, %v909_v15  ;;  %914 = vst [vmem:[%s1571_s9] sm:$0xff] %v910_v16 }
 0x607   :  { %915 = vst [vmem:[%s1571_s9 + $0x8] sm:$0xff] %v911_v17 }
 0x608   :  { %916 = vst [vmem:[%s1571_s9 + $0x10] sm:$0xff] %v912_v18 }
 0x609   :  { %917 = vst [vmem:[%s1571_s9 + $0x18] sm:$0xff] %v913_v19 }

</bundles_post_ra>
